<compile_context>
chip_gen: v7x
topology: tpu7x:2x2x1
jax: 0.10.0
libtpu: 0.0.40
codegen_flags: <defaults>
</compile_context>

<pallas_src>
import jax
import jax.numpy as jnp
from jax.experimental import pallas as pl
from jax.experimental.pallas import tpu as pltpu

NUM_HIDDEN = 3      # num_hidden_layers in the PyTorch module
_LANE = 128         # lane width / batch-column granularity
_TM_MAX = 1024      # max batch columns per grid step
_SUB_MAX = 256      # in-kernel sub-tile width (bounds vreg live ranges)


def _cdiv(a, b):
    return (a + b - 1) // b


def _make_kernel(sub, n_sub):
    def kernel(x_ref, w1_ref, b1_ref, wh_ref, bh_ref, wl_ref, bl_ref,
               o_ref, x0_ref):
        # Static unroll over column sub-tiles.  Every iteration ends with its
        # o_ref store, so no values stay live across iterations (a Python loop
        # is equivalent to fori_loop(unroll=True) here but keeps all slice
        # offsets static -> trivially aligned lane addressing).
        for c in range(n_sub):
            cols = slice(c * sub, (c + 1) * sub)

            # fc_first: (Nh, Ni) @ (Ni, sub) -> (Nh, sub); bf16 MXU, f32 acc.
            xb = x_ref[:, cols].astype(jnp.bfloat16)
            h = (jnp.dot(w1_ref[...], xb, preferred_element_type=jnp.float32)
                 + b1_ref[...])

            # Residual stash in VMEM scratch (bf16: halves scratch st/ld
            # traffic; rounding is negligible vs. the bf16 MXU operands).
            x0_ref[...] = h.astype(jnp.bfloat16)

            # Hidden stack: ReLU -> Linear, NUM_HIDDEN times (static unroll).
            for i in range(NUM_HIDDEN):
                h = jnp.maximum(h, 0.0)
                h = (jnp.dot(wh_ref[i], h.astype(jnp.bfloat16),
                             preferred_element_type=jnp.float32)
                     + bh_ref[i])

            # Residual + ReLU, then fc_last: (No, Nh) @ (Nh, sub) -> (No, sub).
            h = jnp.maximum(x0_ref[...].astype(jnp.float32) + h, 0.0)
            y = (jnp.dot(wl_ref[...], h.astype(jnp.bfloat16),
                         preferred_element_type=jnp.float32)
                 + bl_ref[...])

            # Fully lane-dense store: (No, sub) with sub in {128, 256}.
            o_ref[:, cols] = y.astype(o_ref.dtype)

    return kernel


def conditional_transform_nd(x, kparams):
    """x: (B, Ni) float32. kparams: output of prepare_params()."""
    w1, b1 = kparams["w1"], kparams["b1"]
    wh, bh = kparams["wh"], kparams["bh"]
    wl, bl = kparams["wl"], kparams["bl"]

    B, Ni = x.shape
    Nh = w1.shape[0]
    No = wl.shape[0]

    # Feature-major layout: put the batch on the 128-lane axis.
    xt = x.T                                    # (Ni, B)

    # Tile the (padded) batch into >=2 grid steps when possible (keeps both
    # v7x TensorCores busy), each step <= _TM_MAX columns; padding waste is
    # bounded by one 128-column block per step.
    nb = _cdiv(B, _LANE)                        # number of 128-col blocks
    steps = 1 if nb == 1 else max(2, _cdiv(nb, _TM_MAX // _LANE))
    tm = _cdiv(nb, steps) * _LANE               # batch columns per grid step
    Bp = tm * steps
    if Bp != B:
        xt = jnp.pad(xt, ((0, 0), (0, Bp - B)))

    sub = _SUB_MAX if tm % _SUB_MAX == 0 else _LANE
    n_sub = tm // sub

    out_t = pl.pallas_call(
        _make_kernel(sub, n_sub),
        out_shape=jax.ShapeDtypeStruct((No, Bp), jnp.float32),
        grid_spec=pltpu.PrefetchScalarGridSpec(
            num_scalar_prefetch=0,
            grid=(steps,),
            in_specs=[
                pl.BlockSpec((Ni, tm), lambda i: (0, i)),                 # x^T tile
                pl.BlockSpec((Nh, Ni), lambda i: (0, 0)),                 # w1 (bf16)
                pl.BlockSpec((Nh, 1), lambda i: (0, 0)),                  # b1 (f32)
                pl.BlockSpec((NUM_HIDDEN, Nh, Nh), lambda i: (0, 0, 0)),  # wh (bf16)
                pl.BlockSpec((NUM_HIDDEN, Nh, 1), lambda i: (0, 0, 0)),   # bh (f32)
                pl.BlockSpec((No, Nh), lambda i: (0, 0)),                 # wl (bf16)
                pl.BlockSpec((No, 1), lambda i: (0, 0)),                  # bl (f32)
            ],
            out_specs=pl.BlockSpec((No, tm), lambda i: (0, i)),
            scratch_shapes=[pltpu.VMEM((Nh, sub), jnp.bfloat16)],         # x0
        ),
        compiler_params=pltpu.CompilerParams(
            dimension_semantics=("parallel",)),
    )(xt, w1, b1, wh, bh, wl, bl)

    return out_t[:, :B].T                       # (B, No)


def init_params(key, Ni, No, Nh=64):
    """PyTorch-style f32 parameters: weight (out, in), bias (out,), both
    U(-1/sqrt(fan_in), 1/sqrt(fan_in)) like nn.Linear defaults."""
    keys = jax.random.split(key, 2 * (NUM_HIDDEN + 2))

    def lin(kw, kb, fan_in, fan_out):
        bound = 1.0 / jnp.sqrt(jnp.float32(fan_in))
        w = jax.random.uniform(kw, (fan_out, fan_in), jnp.float32, -bound, bound)
        b = jax.random.uniform(kb, (fan_out,), jnp.float32, -bound, bound)
        return w, b

    w1, b1 = lin(keys[0], keys[1], Ni, Nh)
    wh, bh = [], []
    for i in range(NUM_HIDDEN):
        w, b = lin(keys[2 + 2 * i], keys[3 + 2 * i], Nh, Nh)
        wh.append(w)
        bh.append(b)
    wl, bl = lin(keys[-2], keys[-1], Nh, No)
    return {"w1": w1, "b1": b1,
            "wh": jnp.stack(wh), "bh": jnp.stack(bh),
            "wl": wl, "bl": bl}


def prepare_params(params):
    """One-time conversion to the kernel-ready form: weights cast to bf16
    (grid-invariant -> cast once here, never per grid step), biases reshaped
    to column vectors for the feature-major layout but kept f32 (VPU adds)."""
    return {
        "w1": params["w1"].astype(jnp.bfloat16),            # (Nh, Ni)
        "b1": params["b1"].reshape(-1, 1),                   # (Nh, 1)  f32
        "wh": params["wh"].astype(jnp.bfloat16),             # (H, Nh, Nh)
        "bh": params["bh"].reshape(NUM_HIDDEN, -1, 1),       # (H, Nh, 1) f32
        "wl": params["wl"].astype(jnp.bfloat16),             # (No, Nh)
        "bl": params["bl"].reshape(-1, 1),                   # (No, 1)  f32
    }


def reference(x, params):
    """Pure-JAX f32 reference matching the PyTorch forward exactly."""
    h = x @ params["w1"].T + params["b1"]
    x0 = h
    for i in range(NUM_HIDDEN):
        h = jnp.maximum(h, 0.0)
        h = h @ params["wh"][i].T + params["bh"][i]
    h = jnp.maximum(x0 + h, 0.0)
    return h @ params["wl"].T + params["bl"]


if __name__ == "__main__":
    Ni, No, Nh = 8, 8, 64
    B = 2

    key = jax.random.PRNGKey(0)
    kx, kp = jax.random.split(key)
    x = jax.random.normal(kx, (B, Ni), jnp.float32)
    params = init_params(kp, Ni, No, Nh)
    kparams = prepare_params(params)

    y = conditional_transform_nd(x, kparams)
    y = jax.block_until_ready(y)

    y_ref = reference(x, params)
    assert y.shape == (B, No)
    # bf16 MXU operands (f32 accumulation) vs. f32 reference -> bf16 tolerance.
    assert jnp.allclose(y, y_ref, atol=3e-2, rtol=3e-2), "mismatch vs reference"

    print("KERNEL_OK")
</pallas_src>

<mosaic_0001>
module attributes {stable_mosaic.version = 11 : i64} {
  func.func @kernel(%arg0: i32, %arg1: memref<8x128xf32, #tpu.memory_space<vmem>>, %arg2: memref<64x8xbf16, #tpu.memory_space<vmem>>, %arg3: memref<64x1xf32, #tpu.memory_space<vmem>>, %arg4: memref<3x64x64xbf16, #tpu.memory_space<vmem>>, %arg5: memref<3x64x1xf32, #tpu.memory_space<vmem>>, %arg6: memref<8x64xbf16, #tpu.memory_space<vmem>>, %arg7: memref<8x1xf32, #tpu.memory_space<vmem>>, %arg8: memref<8x128xf32, #tpu.memory_space<vmem>>, %arg9: memref<64x128xbf16, #tpu.memory_space<vmem>>) attributes {dimension_semantics = [#tpu.dimension_semantics<parallel>], iteration_bounds = array<i64: 1>, scalar_prefetch = 0 : i64, scratch_operands = 1 : i64, tpu.core_type = #tpu.core_type<tc>, window_params = [{transform_indices = @transform_0, window_bounds = array<i64: 8, 128>}, {pipeline_mode = #tpu.pipeline_mode<synchronous>, transform_indices = @transform_1, window_bounds = array<i64: 64, 8>}, {pipeline_mode = #tpu.pipeline_mode<synchronous>, transform_indices = @transform_2, window_bounds = array<i64: 64, 1>}, {pipeline_mode = #tpu.pipeline_mode<synchronous>, transform_indices = @transform_3, window_bounds = array<i64: 3, 64, 64>}, {pipeline_mode = #tpu.pipeline_mode<synchronous>, transform_indices = @transform_4, window_bounds = array<i64: 3, 64, 1>}, {pipeline_mode = #tpu.pipeline_mode<synchronous>, transform_indices = @transform_5, window_bounds = array<i64: 8, 64>}, {pipeline_mode = #tpu.pipeline_mode<synchronous>, transform_indices = @transform_6, window_bounds = array<i64: 8, 1>}, {transform_indices = @transform_7, window_bounds = array<i64: 8, 128>}]} {
    %c0 = arith.constant 0 : index
    %c0_0 = arith.constant 0 : index
    %0 = vector.load %arg1[%c0, %c0_0] : memref<8x128xf32, #tpu.memory_space<vmem>>, vector<8x128xf32>
    %1 = arith.truncf %0 : vector<8x128xf32> to vector<8x128xbf16>
    %c0_1 = arith.constant 0 : index
    %c0_2 = arith.constant 0 : index
    %2 = vector.load %arg2[%c0_1, %c0_2] : memref<64x8xbf16, #tpu.memory_space<vmem>>, vector<64x8xbf16>
    %cst = arith.constant dense<0.000000e+00> : vector<64x128xf32>
    %3 = tpu.matmul %2, %1, %cst {dimension_numbers = #tpu.dot_dimension_numbers<[1], [0], [0], [1], [0, 0, 1, 1], [], []>} : vector<64x8xbf16>, vector<8x128xbf16>, vector<64x128xf32> -> vector<64x128xf32>
    %c0_3 = arith.constant 0 : index
    %c0_4 = arith.constant 0 : index
    %4 = vector.load %arg3[%c0_3, %c0_4] : memref<64x1xf32, #tpu.memory_space<vmem>>, vector<64x1xf32>
    %5 = vector.broadcast %4 : vector<64x1xf32> to vector<64x128xf32>
    %6 = arith.addf %3, %5 : vector<64x128xf32>
    %7 = arith.truncf %6 : vector<64x128xf32> to vector<64x128xbf16>
    %c0_5 = arith.constant 0 : index
    %c0_6 = arith.constant 0 : index
    %8 = vector.load %arg9[%c0_5, %c0_6] : memref<64x128xbf16, #tpu.memory_space<vmem>>, vector<64x128xbf16>
    tpu.vector_store %arg9[%c0_5, %c0_6], %7 {strides = array<i32>} : memref<64x128xbf16, #tpu.memory_space<vmem>>, vector<64x128xbf16>,
    %cst_7 = arith.constant 0.000000e+00 : f32
    %9 = vector.broadcast %cst_7 : f32 to vector<64x128xf32>
    %10 = arith.maximumf %6, %9 : vector<64x128xf32>
    %c0_8 = arith.constant 0 : index
    %c0_9 = arith.constant 0 : index
    %c0_10 = arith.constant 0 : index
    %11 = vector.load %arg4[%c0_8, %c0_9, %c0_10] : memref<3x64x64xbf16, #tpu.memory_space<vmem>>, vector<1x64x64xbf16>
    %12 = vector.shape_cast %11 : vector<1x64x64xbf16> to vector<64x64xbf16>
    %13 = arith.truncf %10 : vector<64x128xf32> to vector<64x128xbf16>
    %cst_11 = arith.constant dense<0.000000e+00> : vector<64x128xf32>
    %14 = tpu.matmul %12, %13, %cst_11 {dimension_numbers = #tpu.dot_dimension_numbers<[1], [0], [0], [1], [0, 0, 1, 1], [], []>} : vector<64x64xbf16>, vector<64x128xbf16>, vector<64x128xf32> -> vector<64x128xf32>
    %c0_12 = arith.constant 0 : index
    %c0_13 = arith.constant 0 : index
    %c0_14 = arith.constant 0 : index
    %15 = vector.load %arg5[%c0_12, %c0_13, %c0_14] : memref<3x64x1xf32, #tpu.memory_space<vmem>>, vector<1x64x1xf32>
    %16 = vector.shape_cast %15 : vector<1x64x1xf32> to vector<64x1xf32>
    %17 = vector.broadcast %16 : vector<64x1xf32> to vector<64x128xf32>
    %18 = arith.addf %14, %17 : vector<64x128xf32>
    %cst_15 = arith.constant 0.000000e+00 : f32
    %19 = vector.broadcast %cst_15 : f32 to vector<64x128xf32>
    %20 = arith.maximumf %18, %19 : vector<64x128xf32>
    %c1 = arith.constant 1 : index
    %c0_16 = arith.constant 0 : index
    %c0_17 = arith.constant 0 : index
    %21 = vector.load %arg4[%c1, %c0_16, %c0_17] : memref<3x64x64xbf16, #tpu.memory_space<vmem>>, vector<1x64x64xbf16>
    %22 = vector.shape_cast %21 : vector<1x64x64xbf16> to vector<64x64xbf16>
    %23 = arith.truncf %20 : vector<64x128xf32> to vector<64x128xbf16>
    %cst_18 = arith.constant dense<0.000000e+00> : vector<64x128xf32>
    %24 = tpu.matmul %22, %23, %cst_18 {dimension_numbers = #tpu.dot_dimension_numbers<[1], [0], [0], [1], [0, 0, 1, 1], [], []>} : vector<64x64xbf16>, vector<64x128xbf16>, vector<64x128xf32> -> vector<64x128xf32>
    %c1_19 = arith.constant 1 : index
    %c0_20 = arith.constant 0 : index
    %c0_21 = arith.constant 0 : index
    %25 = vector.load %arg5[%c1_19, %c0_20, %c0_21] : memref<3x64x1xf32, #tpu.memory_space<vmem>>, vector<1x64x1xf32>
    %26 = vector.shape_cast %25 : vector<1x64x1xf32> to vector<64x1xf32>
    %27 = vector.broadcast %26 : vector<64x1xf32> to vector<64x128xf32>
    %28 = arith.addf %24, %27 : vector<64x128xf32>
    %cst_22 = arith.constant 0.000000e+00 : f32
    %29 = vector.broadcast %cst_22 : f32 to vector<64x128xf32>
    %30 = arith.maximumf %28, %29 : vector<64x128xf32>
    %c2 = arith.constant 2 : index
    %c0_23 = arith.constant 0 : index
    %c0_24 = arith.constant 0 : index
    %31 = vector.load %arg4[%c2, %c0_23, %c0_24] : memref<3x64x64xbf16, #tpu.memory_space<vmem>>, vector<1x64x64xbf16>
    %32 = vector.shape_cast %31 : vector<1x64x64xbf16> to vector<64x64xbf16>
    %33 = arith.truncf %30 : vector<64x128xf32> to vector<64x128xbf16>
    %cst_25 = arith.constant dense<0.000000e+00> : vector<64x128xf32>
    %34 = tpu.matmul %32, %33, %cst_25 {dimension_numbers = #tpu.dot_dimension_numbers<[1], [0], [0], [1], [0, 0, 1, 1], [], []>} : vector<64x64xbf16>, vector<64x128xbf16>, vector<64x128xf32> -> vector<64x128xf32>
    %c2_26 = arith.constant 2 : index
    %c0_27 = arith.constant 0 : index
    %c0_28 = arith.constant 0 : index
    %35 = vector.load %arg5[%c2_26, %c0_27, %c0_28] : memref<3x64x1xf32, #tpu.memory_space<vmem>>, vector<1x64x1xf32>
    %36 = vector.shape_cast %35 : vector<1x64x1xf32> to vector<64x1xf32>
    %37 = vector.broadcast %36 : vector<64x1xf32> to vector<64x128xf32>
    %38 = arith.addf %34, %37 : vector<64x128xf32>
    %c0_29 = arith.constant 0 : index
    %c0_30 = arith.constant 0 : index
    %39 = vector.load %arg9[%c0_29, %c0_30] : memref<64x128xbf16, #tpu.memory_space<vmem>>, vector<64x128xbf16>
    %40 = arith.extf %39 : vector<64x128xbf16> to vector<64x128xf32>
    %41 = arith.addf %40, %38 : vector<64x128xf32>
    %cst_31 = arith.constant 0.000000e+00 : f32
    %42 = vector.broadcast %cst_31 : f32 to vector<64x128xf32>
    %43 = arith.maximumf %41, %42 : vector<64x128xf32>
    %c0_32 = arith.constant 0 : index
    %c0_33 = arith.constant 0 : index
    %44 = vector.load %arg6[%c0_32, %c0_33] : memref<8x64xbf16, #tpu.memory_space<vmem>>, vector<8x64xbf16>
    %45 = arith.truncf %43 : vector<64x128xf32> to vector<64x128xbf16>
    %cst_34 = arith.constant dense<0.000000e+00> : vector<8x128xf32>
    %46 = tpu.matmul %44, %45, %cst_34 {dimension_numbers = #tpu.dot_dimension_numbers<[1], [0], [0], [1], [0, 0, 1, 1], [], []>} : vector<8x64xbf16>, vector<64x128xbf16>, vector<8x128xf32> -> vector<8x128xf32>
    %c0_35 = arith.constant 0 : index
    %c0_36 = arith.constant 0 : index
    %47 = vector.load %arg7[%c0_35, %c0_36] : memref<8x1xf32, #tpu.memory_space<vmem>>, vector<8x1xf32>
    %48 = vector.broadcast %47 : vector<8x1xf32> to vector<8x128xf32>
    %49 = arith.addf %46, %48 : vector<8x128xf32>
    %c0_37 = arith.constant 0 : index
    %c0_38 = arith.constant 0 : index
    %50 = vector.load %arg8[%c0_37, %c0_38] : memref<8x128xf32, #tpu.memory_space<vmem>>, vector<8x128xf32>
    tpu.vector_store %arg8[%c0_37, %c0_38], %49 {strides = array<i32>} : memref<8x128xf32, #tpu.memory_space<vmem>>, vector<8x128xf32>,
    return
  }
  func.func @transform_0(%arg0: i32) -> (i32, i32) {
    %c0_i32 = arith.constant 0 : i32
    %c0_i32_0 = arith.constant 0 : i32
    return %c0_i32, %arg0 : i32, i32
  }
  func.func @transform_1(%arg0: i32) -> (i32, i32) {
    %c0_i32 = arith.constant 0 : i32
    %c0_i32_0 = arith.constant 0 : i32
    %c0_i32_1 = arith.constant 0 : i32
    return %c0_i32, %c0_i32_0 : i32, i32
  }
  func.func @transform_2(%arg0: i32) -> (i32, i32) {
    %c0_i32 = arith.constant 0 : i32
    %c0_i32_0 = arith.constant 0 : i32
    %c0_i32_1 = arith.constant 0 : i32
    return %c0_i32, %c0_i32_0 : i32, i32
  }
  func.func @transform_3(%arg0: i32) -> (i32, i32, i32) {
    %c0_i32 = arith.constant 0 : i32
    %c0_i32_0 = arith.constant 0 : i32
    %c0_i32_1 = arith.constant 0 : i32
    %c0_i32_2 = arith.constant 0 : i32
    return %c0_i32, %c0_i32_0, %c0_i32_1 : i32, i32, i32
  }
  func.func @transform_4(%arg0: i32) -> (i32, i32, i32) {
    %c0_i32 = arith.constant 0 : i32
    %c0_i32_0 = arith.constant 0 : i32
    %c0_i32_1 = arith.constant 0 : i32
    %c0_i32_2 = arith.constant 0 : i32
    return %c0_i32, %c0_i32_0, %c0_i32_1 : i32, i32, i32
  }
  func.func @transform_5(%arg0: i32) -> (i32, i32) {
    %c0_i32 = arith.constant 0 : i32
    %c0_i32_0 = arith.constant 0 : i32
    %c0_i32_1 = arith.constant 0 : i32
    return %c0_i32, %c0_i32_0 : i32, i32
  }
  func.func @transform_6(%arg0: i32) -> (i32, i32) {
    %c0_i32 = arith.constant 0 : i32
    %c0_i32_0 = arith.constant 0 : i32
    %c0_i32_1 = arith.constant 0 : i32
    return %c0_i32, %c0_i32_0 : i32, i32
  }
  func.func @transform_7(%arg0: i32) -> (i32, i32) {
    %c0_i32 = arith.constant 0 : i32
    %c0_i32_0 = arith.constant 0 : i32
    return %c0_i32, %arg0 : i32, i32
  }
}

</mosaic_0001>

<bundles_post_ra>
// kernel: tpu_custom_call.1
= control target key start
LH: loop header
LB: loop body
LE: loop exit
PB: predicated region body
PF: predicated region fallthrough
CT: control target
= control target key end

     0   :  { %vm119_vm0 = vcmask 1043456   ;;  %vm106_vm1 = vcmask 64512   ;;  %v1009_v6 = vmov 0   ;;  %s1251_s0 = inlined_call_operand.vmem [shape: f32[8,128], index: 0, kind: input, shape index: {}]   ;;  %s1252_s1 = inlined_call_operand.vmem [shape: bf16[64,8], index: 1, kind: input, shape index: {}]   ;;  %s1253_s2 = inlined_call_operand.vmem [shape: f32[64,1], index: 2, kind: input, shape index: {}]   ;;  %s1254_s3 = inlined_call_operand.vmem [shape: bf16[3,64,64], index: 3, kind: input, shape index: {}]   ;;  %s1255_s4 = inlined_call_operand.vmem [shape: f32[3,64,1], index: 4, kind: input, shape index: {}]   ;;  %s1256_s5 = inlined_call_operand.vmem [shape: bf16[8,64], index: 5, kind: input, shape index: {}]   ;;  %s1257_s6 = inlined_call_operand.vmem [shape: f32[8,1], index: 6, kind: input, shape index: {}]   ;;  %s1258_s7 = inlined_call_operand.hbm [shape: f32[8,128], index: 7, kind: output, shape index: {}]  }
   0x1   :  { %v28_v0 = vld [vmem:[%s1251_s0] sm:$0xff]  ;;  %v970_v4 = vld [vmem:[%s1252_s1 + $0x8] sm:$0xff]   ;;  %v971_v5 = vld [vmem:[%s1252_s1 + $0x10] sm:$0xff]   ;;  %967 = vset.pattern.permute.xlu0 %v1009_v6  ;;  %968 = vset.pattern.permute.xlu1 %v1009_v6 }
   0x2   :  { %v29_v1 = vpack.c.bf16 %v28_v0, %v28_v0  ;;  %v969_v2 = vld [vmem:[%s1252_s1] sm:$0xff]   ;;  %v40_v8 = vld [vmem:[%s1253_s2 + $0x10] sm:$0xff]  ;;  %v39_v9 = vld [vmem:[%s1253_s2 + $0x8] sm:$0xff] }
   0x3   :  { %894 = vmatprep.mubr.msk.bf16.mxu0 %vm106_vm1, %v969_v2  ;;  %v38_v7 = vld [vmem:[%s1253_s2] sm:$0xff]  ;;  %58 = vperm.xlu1 %968, %v40_v8   ;;  %v41_v10 = vld [vmem:[%s1253_s2 + $0x18] sm:$0xff]  ;;  %v43_v13 = vld [vmem:[%s1253_s2 + $0x28] sm:$0xff] }
   0x4   :  { %962 = vmatprep.subr.msk.bf16.mxu0 %vm119_vm0, %v29_v1  ;;  %v121_v3 = vsel %vm119_vm0, %v29_v1, 0  ;;  %48 = vperm.xlu0 %967, %v38_v7   ;;  %v42_v11 = vld [vmem:[%s1253_s2 + $0x20] sm:$0xff]  ;;  %v972_v12 = vld [vmem:[%s1252_s1 + $0x18] sm:$0xff]   ;;  %v44_v14 = vld [vmem:[%s1253_s2 + $0x30] sm:$0xff] }
   0x5   :  { %893 = vmatpush3.bf16.msra.mxu0 %v121_v3  ;;  %v45_v15 = vld [vmem:[%s1253_s2 + $0x38] sm:$0xff]  ;;  %v216_v16 = vld [vmem:[%s1255_s4] sm:$0xff]  ;;  %v217_v17 = vld [vmem:[%s1255_s4 + $0x8] sm:$0xff] }
   0x6   :  { %v218_v18 = vld [vmem:[%s1255_s4 + $0x10] sm:$0xff]  ;;  %v219_v19 = vld [vmem:[%s1255_s4 + $0x18] sm:$0xff] }
   0x7   :  { %63 = vperm.xlu1 %968, %v41_v10  }
   0x8   :  { %895 = vmatmul.mubr.msk.bf16.vlgmr.msra.gmra.mrb[0].mxu0 %vm106_vm1, %v970_v4  ;;  %53 = vperm.xlu0 %967, %v39_v9  }
   0x9   :  { %898 = vmatprep.mubr.msk.bf16.mxu0 %vm106_vm1, %v971_v5 }
   0xb   :  { %73 = vperm.xlu1 %968, %v43_v13  }
   0xc   :  { %68 = vperm.xlu0 %967, %v42_v11  }
   0xf   :  { %83 = vperm.xlu1 %968, %v45_v15  }
  0x10   :  { %899 = vmatmul.mubr.msk.bf16.gmra.mrb[4].mxu0 %vm106_vm1, %v972_v12  ;;  %78 = vperm.xlu0 %967, %v44_v14  }
  0x13   :  { %231 = vperm.xlu1 %968, %v217_v17  }
  0x14   :  { %226 = vperm.xlu0 %967, %v216_v16  }
  0x15   :  { %12 = vsyncpa [#allocation4], 0  ;;  %v220_v20 = vld [vmem:[%s1255_s4 + $0x20] sm:$0xff]  ;;  %v221_v21 = vld [vmem:[%s1255_s4 + $0x28] sm:$0xff]  ;;  %vm284_vm2 = vcmask 523264   ;;  %vm1011_vm3 = vmmov 0  }
  0x16   :  { %v222_v22 = vld [vmem:[%s1255_s4 + $0x30] sm:$0xff]  ;;  %v223_v23 = vld [vmem:[%s1255_s4 + $0x38] sm:$0xff]  ;;  %v817_v24 = vld [vmem:[%s1255_s4 + $0x40] sm:$0xff]  ;;  %s1012_s21 = smov [#allocation3]  }
  0x17   :  { %241 = vperm.xlu1 %968, %v219_v19   ;;  %v818_v25 = vld [vmem:[%s1255_s4 + $0x48] sm:$0xff]  ;;  %v819_v26 = vld [vmem:[%s1255_s4 + $0x50] sm:$0xff]  ;;  %v820_v27 = vld [vmem:[%s1255_s4 + $0x58] sm:$0xff]  ;;  %s785_s22 = sshll.u32 %s1012_s21, 4  ;;  %s786_s22 = int_to_ptr.vmem [resolvable:$true] %s785_s22 }
  0x18   :  { %236 = vperm.xlu0 %967, %v218_v18   ;;  %v821_v28 = vld [vmem:[%s1255_s4 + $0x60] sm:$0xff]  ;;  %v822_v29 = vld [vmem:[%s1255_s4 + $0x68] sm:$0xff]  ;;  %v823_v30 = vld [vmem:[%s1255_s4 + $0x70] sm:$0xff]  ;;  %s985_s23 = scalar_lea.vmem %s786_s22, 128  ;;  %p990_p1 = scmp.lt.s32.totalorder %s786_s22, %s786_s22 }
  0x19   :  { %v824_v31 = vld [vmem:[%s1255_s4 + $0x78] sm:$0xff]  ;;  %v841_v32 = vld [vmem:[%s1255_s4 + $0x80] sm:$0xff]  ;;  %v842_v33 = vld [vmem:[%s1255_s4 + $0x88] sm:$0xff]  ;;  %p986_p0 = scmp.ne.s32.totalorder %s786_s22, %s985_s23  ;;  %p991_p2 = scmp.lt.s32.totalorder %s985_s23, %s985_s23 }
  0x1a   :  { %v843_v34 = vld [vmem:[%s1255_s4 + $0x90] sm:$0xff]  ;;  %v844_v35 = vld [vmem:[%s1255_s4 + $0x98] sm:$0xff]  ;;  %v845_v36 = vld [vmem:[%s1255_s4 + $0xa0] sm:$0xff] }
  0x1b   :  { %251 = vperm.xlu1 %968, %v221_v21   ;;  %v846_v37 = vld [vmem:[%s1255_s4 + $0xa8] sm:$0xff]  ;;  %v847_v38 = vld [vmem:[%s1255_s4 + $0xb0] sm:$0xff]  ;;  %v848_v39 = vld [vmem:[%s1255_s4 + $0xb8] sm:$0xff]  ;;  %p992_p3 = por %p991_p2, %p990_p1 }
  0x1c   :  { %246 = vperm.xlu0 %967, %v220_v20   ;;  %v729_v40 = vld [vmem:[%s1257_s6] sm:$0xff]  ;;  %v974_v18 = vld [vmem:[%s1254_s3 + $0x8] sm:$0xff]   ;;  %v975_v19 = vld [vmem:[%s1254_s3 + $0x10] sm:$0xff]  }
  0x1d   :  { %v973_v41 = vld [vmem:[%s1254_s3] sm:$0xff]   ;;  %v976_v20 = vld [vmem:[%s1254_s3 + $0x18] sm:$0xff]   ;;  %p993_p4 = pnand %p992_p3, %p986_p0 }
  0x1e   :  { %910 = vmatprep.mubr.msk.bf16.mxu1 %vm284_vm2, %v973_v41  ;;  %v977_v21 = vld [vmem:[%s1254_s3 + $0x20] sm:$0xff]  }
  0x1f   :  { %261 = vperm.xlu1 %968, %v223_v23   ;;  %926 = vmatprep.mubr.msk.bf16.mxu0 %vm284_vm2, %v977_v21 }
  0x20   :  { %256 = vperm.xlu0 %967, %v222_v22  }
  0x23   :  { %399 = vperm.xlu1 %968, %v818_v25  }
  0x24   :  { %394 = vperm.xlu0 %967, %v817_v24  }
  0x27   :  { %409 = vperm.xlu1 %968, %v820_v27  }
  0x28   :  { %404 = vperm.xlu0 %967, %v819_v26  }
  0x2b   :  { %419 = vperm.xlu1 %968, %v822_v29  }
  0x2c   :  { %414 = vperm.xlu0 %967, %v821_v28  }
  0x2f   :  { %429 = vperm.xlu1 %968, %v824_v31  }
  0x30   :  { %424 = vperm.xlu0 %967, %v823_v30  }
  0x33   :  { %566 = vperm.xlu1 %968, %v842_v33  }
  0x34   :  { %561 = vperm.xlu0 %967, %v841_v32  }
  0x37   :  { %576 = vperm.xlu1 %968, %v844_v35  }
  0x38   :  { %571 = vperm.xlu0 %967, %v843_v34  }
  0x3b   :  { %586 = vperm.xlu1 %968, %v846_v37  }
  0x3c   :  { %581 = vperm.xlu0 %967, %v845_v36  }
  0x3f   :  { %596 = vperm.xlu1 %968, %v848_v39  }
  0x40   :  { %591 = vperm.xlu0 %967, %v847_v38  }
  0x44   :  { %732 = vperm.xlu0 %967, %v729_v40  }
  0x82   :  { %v59_v43 = vpop.permute.xlu1 %58 }
  0x83   :  { %v49_v42 = vpop.permute.xlu0 %48 }
  0x86   :  { %v64_v45 = vpop.permute.xlu1 %63 }
  0x87   :  { %v54_v44 = vpop.permute.xlu0 %53 }
  0x8a   :  { %v74_v54 = vpop.permute.xlu1 %73 }
  0x8b   :  { %v69_v49 = vpop.permute.xlu0 %68 }
  0x8e   :  { %v84_v4 = vpop.permute.xlu1 %83 }
  0x8f   :  { %v79_v63 = vpop.permute.xlu0 %78 }
  0x92   :  { %v232_v23 = vpop.permute.xlu1 %231 }
  0x93   :  { %v227_v22 = vpop.permute.xlu0 %226 }
  0x96   :  { %v242_v25 = vpop.permute.xlu1 %241 }
  0x97   :  { %v237_v24 = vpop.permute.xlu0 %236 }
  0x9a   :  { %v252_v34 = vpop.permute.xlu1 %251 }
  0x9b   :  { %v247_v29 = vpop.permute.xlu0 %246 }
  0x9f   :  { %v257_v41 = vpop.permute.xlu0 %256 }
  0xdb   :  { %v896_v46 = vpop.f32.mrb[0].mxu0 }
  0xdc   :  { %v166_v47 = vadd.f32 %v896_v46, %v59_v43  ;;  %v157_v48 = vpop.f32.mrb[1].mxu0  ;;  %v262_v46 = vpop.permute.xlu1 %261 }
  0xdd   :  { %v158_v50 = vadd.f32 %v157_v48, %v49_v42  ;;  %v897_v51 = vpop.f32.mrb[2].mxu0 }
  0xde   :  { %v169_v52 = vadd.f32 %v897_v51, %v64_v45  ;;  %v160_v53 = vpop.f32.mrb[3].mxu0  ;;  %v198_v56 = vmax.f32 %v166_v47, 0.0 }
  0xdf   :  { %v161_v55 = vadd.f32 %v160_v53, %v54_v44  ;;  %v196_v59 = vmax.f32 %v158_v50, 0.0 }
  0xe0   :  { %v1175_v57 = vpack.c.bf16 %v169_v52, %v166_v47  ;;  %v199_v58 = vmax.f32 %v169_v52, 0.0 }
  0xe1   :  { %v1177_v60 = vpack.c.bf16 %v161_v55, %v158_v50  ;;  %v197_v61 = vmax.f32 %v161_v55, 0.0 }
  0xe2   :  { %v213_v62 = vpack.c.bf16 %v199_v58, %v198_v56 }
  0xe3   :  { %v900_v0 = vpop.f32.mrb[4].mxu0  ;;  %v212_v1 = vpack.c.bf16 %v197_v61, %v196_v59  ;;  %v978_v59 = vld [vmem:[%s1254_s3 + $0x28] sm:$0xff]   ;;  %v979_v61 = vld [vmem:[%s1254_s3 + $0x30] sm:$0xff]  }
  0xe4   :  { %v182_v2 = vadd.f32 %v900_v0, %v79_v63  ;;  %v173_v3 = vpop.f32.mrb[5].mxu0  ;;  %v981_v63 = vld [vmem:[%s1254_s3 + $0x40] sm:$0xff]   ;;  %v395_v0 = vpop.permute.xlu0 %394 }
  0xe5   :  { %v174_v5 = vadd.f32 %v173_v3, %v69_v49  ;;  %v901_v6 = vpop.f32.mrb[6].mxu0  ;;  %902 = vmatprep.subr.bf16.mxu1 %v212_v1 }
  0xe6   :  { %v185_v7 = vadd.f32 %v901_v6, %v84_v4  ;;  %v176_v8 = vpop.f32.mrb[7].mxu0  ;;  %903 = vmatpush3.bf16.msra.mxu1 %v212_v1  ;;  %v202_v10 = vmax.f32 %v182_v2, 0.0  ;;  %v400_v1 = vpop.permute.xlu1 %399 }
  0xe7   :  { %v177_v9 = vadd.f32 %v176_v8, %v74_v54  ;;  %904 = vmatprep.subr.bf16.mxu1 %v213_v62  ;;  %v200_v13 = vmax.f32 %v174_v5, 0.0 }
  0xe8   :  { %v1179_v11 = vpack.c.bf16 %v185_v7, %v182_v2  ;;  %v203_v12 = vmax.f32 %v185_v7, 0.0  ;;  %v405_v2 = vpop.permute.xlu0 %404 }
  0xe9   :  { %v1181_v14 = vpack.c.bf16 %v177_v9, %v174_v5  ;;  %v201_v15 = vmax.f32 %v177_v9, 0.0 }
  0xea   :  { %905 = vmatpush3.bf16.msra.mxu1 %v213_v62  ;;  %v215_v16 = vpack.c.bf16 %v203_v12, %v202_v10  ;;  %v980_v62 = vld [vmem:[%s1254_s3 + $0x38] sm:$0xff]   ;;  %v410_v3 = vpop.permute.xlu1 %409 }
  0xeb   :  { %v214_v17 = vpack.c.bf16 %v201_v15, %v200_v13 }
  0xec   :  { %v415_v7 = vpop.permute.xlu0 %414 }
  0xed   :  { %906 = vmatprep.subr.bf16.mxu1 %v214_v17 }
  0xee   :  { %907 = vmatpush3.bf16.msra.mxu1 %v214_v17  ;;  %v420_v13 = vpop.permute.xlu1 %419 }
  0xef   :  { %908 = vmatprep.subr.bf16.mxu1 %v215_v16 }
  0xf0   :  { %v425_v21 = vpop.permute.xlu0 %424 }
  0xf2   :  { %909 = vmatpush3.bf16.msra.mxu1 %v215_v16 }
  0xf5   :  { %911 = vmatmul.mubr.msk.bf16.vlgmr.msra.gmra.mrb[0].mxu1 %vm284_vm2, %v974_v18 }
  0xf6   :  { %914 = vmatprep.mubr.msk.bf16.mxu1 %vm284_vm2, %v975_v19 }
  0xfd   :  { %915 = vmatmul.mubr.msk.bf16.gmra.mrb[4].mxu1 %vm284_vm2, %v976_v20 }
  0xfe   :  { %942 = vmatprep.mubr.msk.bf16.mxu1 %vm284_vm2, %v981_v63  ;;  %v701_v63 = vunpack.c.h.bf16 %v1177_v60 }
 0x1c8   :  { %v912_v26 = vpop.f32.mrb[0].mxu1 }
 0x1c9   :  { %v340_v27 = vadd.f32 %v912_v26, %v237_v24  ;;  %v331_v28 = vpop.f32.mrb[1].mxu1  ;;  %v430_v26 = vpop.permute.xlu1 %429 }
 0x1ca   :  { %v332_v30 = vadd.f32 %v331_v28, %v227_v22  ;;  %v913_v31 = vpop.f32.mrb[2].mxu1 }
 0x1cb   :  { %v343_v32 = vadd.f32 %v913_v31, %v242_v25  ;;  %v334_v33 = vpop.f32.mrb[3].mxu1  ;;  %v364_v36 = vmax.f32 %v340_v27, 0.0 }
 0x1cc   :  { %v335_v35 = vadd.f32 %v334_v33, %v232_v23  ;;  %v362_v38 = vmax.f32 %v332_v30, 0.0 }
 0x1cd   :  { %v365_v37 = vmax.f32 %v343_v32, 0.0 }
 0x1ce   :  { %v363_v39 = vmax.f32 %v335_v35, 0.0 }
 0x1cf   :  { %v380_v40 = vpack.c.bf16 %v365_v37, %v364_v36 }
 0x1d0   :  { %v379_v42 = vpack.c.bf16 %v363_v39, %v362_v38  ;;  %v916_v43 = vpop.f32.mrb[4].mxu1  ;;  %v982_v38 = vld [vmem:[%s1254_s3 + $0x48] sm:$0xff]   ;;  %v983_v39 = vld [vmem:[%s1254_s3 + $0x50] sm:$0xff]  }
 0x1d1   :  { %v356_v44 = vadd.f32 %v916_v43, %v257_v41  ;;  %v347_v45 = vpop.f32.mrb[5].mxu1  ;;  %v1010_v41 = vmov 0.0   ;;  %v567_v43 = vpop.permute.xlu1 %566 }
 0x1d2   :  { %v348_v47 = vadd.f32 %v347_v45, %v247_v29  ;;  %v917_v48 = vpop.f32.mrb[6].mxu1  ;;  %918 = vmatprep.subr.bf16.mxu0 %v379_v42 }
 0x1d3   :  { %v359_v49 = vadd.f32 %v917_v48, %v262_v46  ;;  %v350_v50 = vpop.f32.mrb[7].mxu1  ;;  %919 = vmatpush3.bf16.msra.mxu0 %v379_v42  ;;  %v368_v52 = vmax.f32 %v356_v44, 0.0  ;;  %v562_v42 = vpop.permute.xlu0 %561  ;;  %v702_v48 = vunpack.c.l.bf16 %v1175_v57 }
 0x1d4   :  { %v351_v51 = vadd.f32 %v350_v50, %v252_v34  ;;  %920 = vmatprep.subr.bf16.mxu0 %v380_v40  ;;  %v366_v54 = vmax.f32 %v348_v47, 0.0 }
 0x1d5   :  { %v369_v53 = vmax.f32 %v359_v49, 0.0  ;;  %v577_v45 = vpop.permute.xlu1 %576 }
 0x1d6   :  { %v367_v55 = vmax.f32 %v351_v51, 0.0 }
 0x1d7   :  { %v382_v56 = vpack.c.bf16 %v369_v53, %v368_v52  ;;  %921 = vmatpush3.bf16.msra.mxu0 %v380_v40  ;;  %v984_v40 = vld [vmem:[%s1254_s3 + $0x58] sm:$0xff]   ;;  %v572_v44 = vpop.permute.xlu0 %571  ;;  %v700_v52 = vunpack.c.l.bf16 %v1177_v60 }
 0x1d8   :  { %v381_v58 = vpack.c.bf16 %v367_v55, %v366_v54 }
 0x1da   :  { %922 = vmatprep.subr.bf16.mxu0 %v381_v58 }
 0x1db   :  { %923 = vmatpush3.bf16.msra.mxu0 %v381_v58  ;;  %v582_v50 = vpop.permute.xlu0 %581 }
 0x1dc   :  { %924 = vmatprep.subr.bf16.mxu0 %v382_v56 }
 0x1df   :  { %925 = vmatpush3.bf16.msra.mxu0 %v382_v56  ;;  %v703_v56 = vunpack.c.h.bf16 %v1175_v57 }
 0x1e0   :  { %950 = vmatprep.subr.bf16.mxu0 %v1010_v41 }
 0x1e2   :  { %927 = vmatmul.mubr.msk.bf16.vlgmr.msra.gmra.mrb[8].mxu0 %vm284_vm2, %v978_v59  ;;  %v587_v59 = vpop.permute.xlu1 %586 }
 0x1e3   :  { %930 = vmatprep.mubr.msk.bf16.mxu0 %vm284_vm2, %v979_v61 }
 0x1e6   :  { %v597_v57 = vpop.permute.xlu1 %596 }
 0x1ea   :  { %931 = vmatmul.mubr.msk.bf16.gmra.mrb[12].mxu0 %vm284_vm2, %v980_v62 }
 0x1eb   :  { %958 = vmatprep.mubr.msk.bf16.mxu0 %vm1011_vm3, %v1010_v41 }
 0x2b5   :  { %v928_v4 = vpop.f32.mrb[8].mxu0 }
 0x2b6   :  { %v507_v5 = vadd.f32 %v928_v4, %v405_v2  ;;  %v498_v6 = vpop.f32.mrb[9].mxu0  ;;  %v592_v4 = vpop.permute.xlu0 %591 }
 0x2b7   :  { %v499_v8 = vadd.f32 %v498_v6, %v395_v0  ;;  %v929_v9 = vpop.f32.mrb[10].mxu0 }
 0x2b8   :  { %v510_v10 = vadd.f32 %v929_v9, %v410_v3  ;;  %v501_v12 = vpop.f32.mrb[11].mxu0  ;;  %v531_v16 = vmax.f32 %v507_v5, 0.0 }
 0x2b9   :  { %v502_v15 = vadd.f32 %v501_v12, %v400_v1  ;;  %v529_v18 = vmax.f32 %v499_v8, 0.0 }
 0x2ba   :  { %v532_v17 = vmax.f32 %v510_v10, 0.0  ;;  %v706_v10 = vunpack.c.l.bf16 %v1179_v11 }
 0x2bb   :  { %v530_v19 = vmax.f32 %v502_v15, 0.0 }
 0x2bc   :  { %v547_v20 = vpack.c.bf16 %v532_v17, %v531_v16  ;;  %v704_v16 = vunpack.c.l.bf16 %v1181_v14 }
 0x2bd   :  { %v546_v22 = vpack.c.bf16 %v530_v19, %v529_v18  ;;  %v932_v23 = vpop.f32.mrb[12].mxu0  ;;  %v707_v19 = vunpack.c.h.bf16 %v1179_v11  ;;  %v724_v11 = vld [vmem:[%s1256_s5] sm:$0xf] }
 0x2be   :  { %v523_v24 = vadd.f32 %v932_v23, %v425_v21  ;;  %v514_v25 = vpop.f32.mrb[13].mxu0  ;;  %v705_v23 = vunpack.c.h.bf16 %v1181_v14  ;;  %v733_v14 = vpop.permute.xlu0 %732 }
 0x2bf   :  { %v515_v27 = vadd.f32 %v514_v25, %v415_v7  ;;  %v933_v28 = vpop.f32.mrb[14].mxu0  ;;  %934 = vmatprep.subr.bf16.mxu1 %v546_v22 }
 0x2c0   :  { %v526_v29 = vadd.f32 %v933_v28, %v430_v26  ;;  %v517_v30 = vpop.f32.mrb[15].mxu0  ;;  %935 = vmatpush3.bf16.msra.mxu1 %v546_v22  ;;  %v535_v32 = vmax.f32 %v523_v24, 0.0 }
 0x2c1   :  { %v518_v31 = vadd.f32 %v517_v30, %v420_v13  ;;  %936 = vmatprep.subr.bf16.mxu1 %v547_v20  ;;  %v533_v34 = vmax.f32 %v515_v27, 0.0 }
 0x2c2   :  { %v536_v33 = vmax.f32 %v526_v29, 0.0 }
 0x2c3   :  { %v534_v35 = vmax.f32 %v518_v31, 0.0 }
 0x2c4   :  { %v549_v36 = vpack.c.bf16 %v536_v33, %v535_v32  ;;  %937 = vmatpush3.bf16.msra.mxu1 %v547_v20 }
 0x2c5   :  { %v548_v37 = vpack.c.bf16 %v534_v35, %v533_v34 }
 0x2c7   :  { %938 = vmatprep.subr.bf16.mxu1 %v548_v37 }
 0x2c8   :  { %939 = vmatpush3.bf16.msra.mxu1 %v548_v37 }
 0x2c9   :  { %940 = vmatprep.subr.bf16.mxu1 %v549_v36 }
 0x2cc   :  { %941 = vmatpush3.bf16.msra.mxu1 %v549_v36 }
 0x2cf   :  { %943 = vmatmul.mubr.msk.bf16.vlgmr.msra.gmra.mrb[8].mxu1 %vm284_vm2, %v982_v38 }
 0x2d0   :  { %946 = vmatprep.mubr.msk.bf16.mxu1 %vm284_vm2, %v983_v39 }
 0x2d7   :  { %947 = vmatmul.mubr.msk.bf16.gmra.mrb[12].mxu1 %vm284_vm2, %v984_v40 }
 0x3a2   :  { %v944_v46 = vpop.f32.mrb[8].mxu1 }
 0x3a3   :  { %v674_v47 = vadd.f32 %v944_v46, %v572_v44  ;;  %v665_v49 = vpop.f32.mrb[9].mxu1 }
 0x3a4   :  { %v666_v51 = vadd.f32 %v665_v49, %v562_v42  ;;  %v945_v53 = vpop.f32.mrb[10].mxu1 }
 0x3a5   :  { %v710_v54 = vadd.f32 %v702_v48, %v674_v47  ;;  %v677_v55 = vadd.f32 %v945_v53, %v577_v45  ;;  %v668_v58 = vpop.f32.mrb[11].mxu1 }
 0x3a6   :  { %v708_v61 = vadd.f32 %v700_v52, %v666_v51  ;;  %v669_v62 = vadd.f32 %v668_v58, %v567_v43 }
 0x3a7   :  { %v711_v0 = vadd.f32 %v703_v56, %v677_v55  ;;  %v718_v2 = vmax.f32 %v710_v54, 0.0 }
 0x3a8   :  { %v709_v1 = vadd.f32 %v701_v63, %v669_v62  ;;  %v716_v5 = vmax.f32 %v708_v61, 0.0 }
 0x3a9   :  { %v719_v3 = vmax.f32 %v711_v0, 0.0 }
 0x3aa   :  { %v717_v6 = vmax.f32 %v709_v1, 0.0  ;;  %v948_v7 = vpop.f32.mrb[12].mxu1 }
 0x3ab   :  { %v726_v8 = vpack.c.bf16 %v719_v3, %v718_v2  ;;  %v690_v9 = vadd.f32 %v948_v7, %v592_v4  ;;  %v681_v12 = vpop.f32.mrb[13].mxu1 }
 0x3ac   :  { %v725_v13 = vpack.c.bf16 %v717_v6, %v716_v5  ;;  %v682_v15 = vadd.f32 %v681_v12, %v582_v50  ;;  %v949_v17 = vpop.f32.mrb[14].mxu1 }
 0x3ad   :  { %v714_v60 = vadd.f32 %v706_v10, %v690_v9  ;;  %v693_v18 = vadd.f32 %v949_v17, %v597_v57  ;;  %v684_v20 = vpop.f32.mrb[15].mxu1 }
 0x3ae   :  { %v712_v21 = vadd.f32 %v704_v16, %v682_v15  ;;  %v685_v22 = vadd.f32 %v684_v20, %v587_v59  ;;  %951 = vmatpush3.bf16.msra.mxu0 %v725_v13 }
 0x3af   :  { %v715_v24 = vadd.f32 %v707_v19, %v693_v18  ;;  %952 = vmatprep.subr.bf16.mxu0 %v1010_v41  ;;  %v722_v26 = vmax.f32 %v714_v60, 0.0 }
 0x3b0   :  { %v713_v25 = vadd.f32 %v705_v23, %v685_v22  ;;  %v720_v28 = vmax.f32 %v712_v21, 0.0 }
 0x3b1   :  { %v723_v27 = vmax.f32 %v715_v24, 0.0 }
 0x3b2   :  { %v721_v29 = vmax.f32 %v713_v25, 0.0  ;;  %953 = vmatpush3.bf16.msra.mxu0 %v726_v8 }
 0x3b3   :  { %v728_v30 = vpack.c.bf16 %v723_v27, %v722_v26  ;;  %954 = vmatprep.subr.bf16.mxu0 %v1010_v41 }
 0x3b4   :  { %v727_v31 = vpack.c.bf16 %v721_v29, %v720_v28 }
 0x3b6   :  { %955 = vmatpush3.bf16.msra.mxu0 %v727_v31 }
 0x3b7   :  { %956 = vmatprep.subr.bf16.mxu0 %v1010_v41 }
 0x3ba   :  { %957 = vmatpush3.bf16.msra.mxu0 %v728_v30 }
 0x3bd   :  { %959 = vmatmul.mubr.msk.bf16.vlgmr.msra.gmra.mrb[16].mxu0 %vm284_vm2, %v724_v11 }
 0x490   :  { %v772_v32 = vpop.f32.mrb[16].mxu0 }
 0x491   :  { %v773_v33 = vadd.f32 %v772_v32, %v733_v14  ;;  %v960_v34 = vpop.f32.mrb[17].mxu0 }
 0x492   :  { %v775_v35 = vpop.f32.mrb[18].mxu0 }
 0x493   :  { %778 = vst [vmem:[#allocation3] sm:$0xff] %v773_v33  ;;  %v961_v36 = vpop.f32.mrb[19].mxu0 }
 0x494   :  { %996 = shalt.err (!%p993_p4)
}
 0x495   :  { %s997_s25 = scalar_lea.hbm %s1258_s7, 128 }
 0x496   :  { %p998_p5 = scmp.ne.s32.totalorder %s1258_s7, %s997_s25  ;;  %p1001_p6 = scmp.lt.u32.totalorder %s997_s25, %s1258_s7 }
 0x498   :  { %p1003_p7 = pnand %p1001_p6, %p998_p5 }
 0x49a   :  { %1006 = shalt.err (!%p1003_p7)
}
 0x49b   :  { %788 = dma.vmem_to_hbm [thread:$0]  %s786_s22, 128, %s1258_s7, [#allocation4]  }
 0x49c   :  { %1007 = dma.done.wait [#allocation4], 128  }
 0x49d   :  { %1008 = vsyncadd [#allocation4], 4294967168 }
 0x49e   :  { %792 = vsyncpa [#allocation4], 1 }

</bundles_post_ra>
